<compile_context>
chip_gen: v7x
topology: tpu7x:2x2x1
jax: 0.10.0
libtpu: 0.0.40
codegen_flags: <defaults>
</compile_context>

<pallas_src>
import functools

import jax
import jax.numpy as jnp
from jax.experimental import pallas as pl
from jax.experimental.pallas import tpu as pltpu


_MASK_FILL = -1e30  # finite "-inf": keeps softmax NaN-free even for fully-masked rows


# -----------------------------------------------------------------------------
# Pallas kernel: one (batch, q-tile) grid step
# -----------------------------------------------------------------------------
def _sdpa_kernel(*refs, scale, mask_kind):
    """Block shapes seen by the kernel:
         q:    (1, TQ, D)
         k:    (1, Lk, D)   -- resident across q-tiles of a batch
         v:    (1, Lk, Dv)  -- resident across q-tiles of a batch
         mask: (1, 1, Lk)  f32 additive bias          (mask_kind == "bias")
               (1, TQ, Lk) int8, nonzero == masked    (mask_kind == "full")
         out:  (1, TQ, Dv)
         attn: (1, TQ, Lk)
    """
    if mask_kind is None:
        q_ref, k_ref, v_ref, out_ref, attn_ref = refs
        mask_ref = None
    else:
        q_ref, k_ref, v_ref, mask_ref, out_ref, attn_ref = refs

    q = q_ref[...]
    k = k_ref[...]
    v = v_ref[...]

    # Fold scale into the (small) q tile instead of the (big) logits tile.
    if scale:  # mirrors the reference module's `if scale:` truthiness
        q = q * scale

    # q @ k^T on the MXU; contract last dims directly (no transpose of k),
    # accumulate in f32.
    att = jnp.einsum("bqd,bkd->bqk", q, k, preferred_element_type=jnp.float32)

    if mask_kind == "bias":
        att = att + mask_ref[...]                        # (1,1,Lk) broadcast add
    elif mask_kind == "full":
        att = jnp.where(mask_ref[...] != 0, _MASK_FILL, att)

    # Numerically stable softmax in f32 with EXACT row normalization
    # (approx reciprocal broke the row-sum == 1 property).
    att = att - jnp.max(att, axis=-1, keepdims=True)
    p = jnp.exp(att)
    inv_denom = 1.0 / jnp.sum(p, axis=-1, keepdims=True)
    p = p * inv_denom

    attn_ref[...] = p.astype(attn_ref.dtype)

    # TODO(synk): nn.Dropout(attention_dropout=0.0) is an exact identity -> omitted.
    # P @ V: feed MXU operands in v's dtype (bf16-native on v6e/v7x), f32 accumulation.
    out_ref[...] = jnp.einsum(
        "bqk,bkd->bqd", p.astype(v.dtype), v,
        preferred_element_type=jnp.float32).astype(out_ref.dtype)


# -----------------------------------------------------------------------------
# Wrapper
# -----------------------------------------------------------------------------
def scaled_dot_product_attention(q, k, v, scale=None, mask=None, *, block_q=None):
    """q: [B, Lq, D], k: [B, Lk, D], v: [B, Lk, Dv].

    mask: None,
          [B, Lk]     key-padding mask (True = masked)   -> additive-bias fast path
          [B, Lq, Lk] full mask (True = masked)          -> module semantics

    Returns (outputs [B, Lq, Dv], attention [B, Lq, Lk]), both in q.dtype.
    """
    B, Lq, D = q.shape
    _, Lk, Dk = k.shape
    Dv = v.shape[2]

    # Query tile: 256 keeps the v6e/v7x 256-row MXU full; fall back to Lq when
    # it does not divide. VMEM per step is ~2x(TQ*(Lk+D+Dv)) + Lk*(D+Dv) words,
    # well inside the 32 MiB scoped default even on v7x for these tiles.
    if block_q is None:
        block_q = min(Lq, 256)
    if Lq % block_q != 0:
        block_q = Lq
    num_q_tiles = Lq // block_q

    operands = [q, k, v]
    in_specs = [
        pl.BlockSpec((1, block_q, D), lambda b, qi: (b, qi, 0)),
        pl.BlockSpec((1, Lk, Dk), lambda b, qi: (b, 0, 0)),    # K resident per batch
        pl.BlockSpec((1, Lk, Dv), lambda b, qi: (b, 0, 0)),    # V resident per batch
    ]

    mask_kind = None
    if mask is not None:
        if mask.ndim == 2:
            # Key-padding mask: ship a tiny [B, 1, Lk] additive bias instead of a
            # materialized [B, Lq, Lk] f32 mask (saves B*Lq*Lk*4 bytes of HBM reads).
            mask_kind = "bias"
            bias = jnp.where(mask, jnp.float32(_MASK_FILL), jnp.float32(0.0))
            operands.append(bias.reshape(B, 1, Lk))
            in_specs.append(pl.BlockSpec((1, 1, Lk), lambda b, qi: (b, 0, 0)))
        else:
            # General [B, Lq, Lk] mask (module signature): int8, tiled like attn.
            mask_kind = "full"
            operands.append(mask.astype(jnp.int8))
            in_specs.append(pl.BlockSpec((1, block_q, Lk), lambda b, qi: (b, qi, 0)))

    out_specs = (
        pl.BlockSpec((1, block_q, Dv), lambda b, qi: (b, qi, 0)),
        pl.BlockSpec((1, block_q, Lk), lambda b, qi: (b, qi, 0)),
    )
    out_shape = (
        jax.ShapeDtypeStruct((B, Lq, Dv), q.dtype),
        jax.ShapeDtypeStruct((B, Lq, Lk), q.dtype),   # attn in the input dtype
    )

    kernel = functools.partial(
        _sdpa_kernel,
        scale=(float(scale) if scale is not None else None),
        mask_kind=mask_kind,
    )

    # TODO(synk): for very long Lk where resident K/V no longer fits VMEM,
    # add a k-axis ("arbitrary") with flash-style online softmax.
    out, attn = pl.pallas_call(
        kernel,
        grid=(B, num_q_tiles),
        in_specs=in_specs,
        out_specs=out_specs,
        out_shape=out_shape,
        compiler_params=pltpu.CompilerParams(
            dimension_semantics=("parallel", "parallel")),
    )(*operands)
    return out, attn


# -----------------------------------------------------------------------------
# Pure-JAX reference (matches the PyTorch module semantics)
# -----------------------------------------------------------------------------
def sdpa_reference(q, k, v, scale=None, mask=None):
    att = jnp.einsum("bqd,bkd->bqk", q, k)
    if scale:
        att = att * scale
    if mask is not None:
        att = jnp.where(mask, -jnp.inf, att)
    att = jax.nn.softmax(att, axis=-1)
    out = jnp.einsum("bqk,bkd->bqd", att, v)
    return out, att


# -----------------------------------------------------------------------------
# Main
# -----------------------------------------------------------------------------
if __name__ == "__main__":
    # Small, lane-dense shapes (last dims are multiples of 128); block_q=64
    # exercises the (batch, q-tile) grid with 2 q-tiles per batch.
    B, Lq, Lk, D = 2, 128, 256, 128

    key = jax.random.PRNGKey(0)
    kq, kk, kv = jax.random.split(key, 3)
    q = jax.random.normal(kq, (B, Lq, D), jnp.float32)
    k = jax.random.normal(kk, (B, Lk, D), jnp.float32)
    v = jax.random.normal(kv, (B, Lk, D), jnp.float32)
    scale = float(D) ** -0.5

    # Padding-style mask: last 32 key positions of batch 0 are masked out.
    key_pad = jnp.zeros((B, Lk), bool).at[0, Lk - 32:].set(True)
    mask3d = jnp.broadcast_to(key_pad[:, None, :], (B, Lq, Lk))

    ref_out, ref_attn = sdpa_reference(q, k, v, scale=scale, mask=mask3d)

    # 1) Efficient key-padding mask path ([B, Lk]).
    out, attn = scaled_dot_product_attention(q, k, v, scale=scale, mask=key_pad,
                                             block_q=64)
    jax.block_until_ready((out, attn))
    assert out.shape == (B, Lq, D) and attn.shape == (B, Lq, Lk)
    assert bool(jnp.all(jnp.isfinite(out))) and bool(jnp.all(jnp.isfinite(attn)))
    assert bool(jnp.allclose(jnp.sum(attn, axis=-1), 1.0, atol=2e-3))
    assert bool(jnp.all(attn[0, :, Lk - 32:] < 1e-6))          # masked keys ~ zero prob
    assert bool(jnp.allclose(attn, ref_attn, atol=2e-3, rtol=2e-3))
    assert bool(jnp.allclose(out, ref_out, atol=2e-3, rtol=2e-3))

    # 2) General [B, Lq, Lk] mask path (module signature).
    out3, attn3 = scaled_dot_product_attention(q, k, v, scale=scale, mask=mask3d,
                                               block_q=64)
    jax.block_until_ready((out3, attn3))
    assert bool(jnp.allclose(attn3, ref_attn, atol=2e-3, rtol=2e-3))
    assert bool(jnp.allclose(out3, ref_out, atol=2e-3, rtol=2e-3))

    # 3) mask=None / scale=None path.
    out2, attn2 = scaled_dot_product_attention(q, k, v, block_q=64)
    jax.block_until_ready((out2, attn2))
    ref_out2, ref_attn2 = sdpa_reference(q, k, v)
    assert bool(jnp.allclose(attn2, ref_attn2, atol=2e-3, rtol=2e-3))
    assert bool(jnp.allclose(out2, ref_out2, atol=2e-3, rtol=2e-3))

    print("KERNEL_OK")
</pallas_src>

<mosaic_0001>
module attributes {stable_mosaic.version = 11 : i64} {
  func.func @_sdpa_kernel(%arg0: i32, %arg1: i32, %arg2: memref<1x64x128xf32, #tpu.memory_space<vmem>>, %arg3: memref<1x256x128xf32, #tpu.memory_space<vmem>>, %arg4: memref<1x256x128xf32, #tpu.memory_space<vmem>>, %arg5: memref<1x1x256xf32, #tpu.memory_space<vmem>>, %arg6: memref<1x64x128xf32, #tpu.memory_space<vmem>>, %arg7: memref<1x64x256xf32, #tpu.memory_space<vmem>>) attributes {dimension_semantics = [#tpu.dimension_semantics<parallel>, #tpu.dimension_semantics<parallel>], iteration_bounds = array<i64: 2, 2>, scalar_prefetch = 0 : i64, scratch_operands = 0 : i64, tpu.core_type = #tpu.core_type<tc>, window_params = [{transform_indices = @transform_0, window_bounds = array<i64: 1, 64, 128>}, {transform_indices = @transform_1, window_bounds = array<i64: 1, 256, 128>}, {transform_indices = @transform_2, window_bounds = array<i64: 1, 256, 128>}, {transform_indices = @transform_3, window_bounds = array<i64: 1, 1, 256>}, {transform_indices = @transform_4, window_bounds = array<i64: 1, 64, 128>}, {transform_indices = @transform_5, window_bounds = array<i64: 1, 64, 256>}]} {
    %c0 = arith.constant 0 : index
    %c0_0 = arith.constant 0 : index
    %c0_1 = arith.constant 0 : index
    %0 = vector.load %arg2[%c0, %c0_0, %c0_1] : memref<1x64x128xf32, #tpu.memory_space<vmem>>, vector<1x64x128xf32>
    %c0_2 = arith.constant 0 : index
    %c0_3 = arith.constant 0 : index
    %c0_4 = arith.constant 0 : index
    %1 = vector.load %arg3[%c0_2, %c0_3, %c0_4] : memref<1x256x128xf32, #tpu.memory_space<vmem>>, vector<1x256x128xf32>
    %c0_5 = arith.constant 0 : index
    %c0_6 = arith.constant 0 : index
    %c0_7 = arith.constant 0 : index
    %2 = vector.load %arg4[%c0_5, %c0_6, %c0_7] : memref<1x256x128xf32, #tpu.memory_space<vmem>>, vector<1x256x128xf32>
    %cst = arith.constant 0.0883883461 : f32
    %3 = vector.broadcast %cst : f32 to vector<1x64x128xf32>
    %4 = arith.mulf %0, %3 : vector<1x64x128xf32>
    "tpu.trace_start"() <{level = 10 : i32, message = "bqd,bkd->bqk"}> : () -> ()
    %cst_8 = arith.constant dense<0.000000e+00> : vector<1x64x256xf32>
    %5 = tpu.matmul %4, %1, %cst_8 {dimension_numbers = #tpu.dot_dimension_numbers<[2], [2], [1], [1], [0, 0, 0, 1, 1, 1], [0], [0]>} : vector<1x64x128xf32>, vector<1x256x128xf32>, vector<1x64x256xf32> -> vector<1x64x256xf32>
    "tpu.trace_stop"() : () -> ()
    %c0_9 = arith.constant 0 : index
    %c0_10 = arith.constant 0 : index
    %c0_11 = arith.constant 0 : index
    %6 = vector.load %arg5[%c0_9, %c0_10, %c0_11] : memref<1x1x256xf32, #tpu.memory_space<vmem>>, vector<1x1x256xf32>
    %7 = vector.broadcast %6 : vector<1x1x256xf32> to vector<1x64x256xf32>
    %8 = arith.addf %5, %7 : vector<1x64x256xf32>
    %cst_12 = arith.constant dense<0xFF800000> : vector<1x64xf32>
    %9 = vector.multi_reduction <maximumf>, %8, %cst_12 [2] : vector<1x64x256xf32> to vector<1x64xf32>
    %10 = vector.shape_cast %9 : vector<1x64xf32> to vector<1x64x1xf32>
    %11 = vector.broadcast %10 : vector<1x64x1xf32> to vector<1x64x256xf32>
    %12 = arith.subf %8, %11 : vector<1x64x256xf32>
    %13 = math.exp %12 : vector<1x64x256xf32>
    %cst_13 = arith.constant dense<0.000000e+00> : vector<1x64xf32>
    %14 = vector.multi_reduction <add>, %13, %cst_13 [2] : vector<1x64x256xf32> to vector<1x64xf32>
    %15 = vector.shape_cast %14 : vector<1x64xf32> to vector<1x64x1xf32>
    %cst_14 = arith.constant 1.000000e+00 : f32
    %16 = vector.broadcast %cst_14 : f32 to vector<1x64x1xf32>
    %17 = arith.divf %16, %15 : vector<1x64x1xf32>
    %18 = vector.broadcast %17 : vector<1x64x1xf32> to vector<1x64x256xf32>
    %19 = arith.mulf %13, %18 : vector<1x64x256xf32>
    %c0_15 = arith.constant 0 : index
    %c0_16 = arith.constant 0 : index
    %c0_17 = arith.constant 0 : index
    %20 = vector.load %arg7[%c0_15, %c0_16, %c0_17] : memref<1x64x256xf32, #tpu.memory_space<vmem>>, vector<1x64x256xf32>
    tpu.vector_store %arg7[%c0_15, %c0_16, %c0_17], %19 {strides = array<i32>} : memref<1x64x256xf32, #tpu.memory_space<vmem>>, vector<1x64x256xf32>,
    "tpu.trace_start"() <{level = 10 : i32, message = "bqk,bkd->bqd"}> : () -> ()
    %cst_18 = arith.constant dense<0.000000e+00> : vector<1x64x128xf32>
    %21 = tpu.matmul %19, %2, %cst_18 {dimension_numbers = #tpu.dot_dimension_numbers<[2], [1], [1], [2], [0, 0, 0, 1, 1, 2], [0], [0]>} : vector<1x64x256xf32>, vector<1x256x128xf32>, vector<1x64x128xf32> -> vector<1x64x128xf32>
    "tpu.trace_stop"() : () -> ()
    %c0_19 = arith.constant 0 : index
    %c0_20 = arith.constant 0 : index
    %c0_21 = arith.constant 0 : index
    %22 = vector.load %arg6[%c0_19, %c0_20, %c0_21] : memref<1x64x128xf32, #tpu.memory_space<vmem>>, vector<1x64x128xf32>
    tpu.vector_store %arg6[%c0_19, %c0_20, %c0_21], %21 {strides = array<i32>} : memref<1x64x128xf32, #tpu.memory_space<vmem>>, vector<1x64x128xf32>,
    return
  }
  func.func @transform_0(%arg0: i32, %arg1: i32) -> (i32, i32, i32) {
    %c0_i32 = arith.constant 0 : i32
    %c0_i32_0 = arith.constant 0 : i32
    return %arg0, %arg1, %c0_i32 : i32, i32, i32
  }
  func.func @transform_1(%arg0: i32, %arg1: i32) -> (i32, i32, i32) {
    %c0_i32 = arith.constant 0 : i32
    %c0_i32_0 = arith.constant 0 : i32
    %c0_i32_1 = arith.constant 0 : i32
    return %arg0, %c0_i32, %c0_i32_0 : i32, i32, i32
  }
  func.func @transform_2(%arg0: i32, %arg1: i32) -> (i32, i32, i32) {
    %c0_i32 = arith.constant 0 : i32
    %c0_i32_0 = arith.constant 0 : i32
    %c0_i32_1 = arith.constant 0 : i32
    return %arg0, %c0_i32, %c0_i32_0 : i32, i32, i32
  }
  func.func @transform_3(%arg0: i32, %arg1: i32) -> (i32, i32, i32) {
    %c0_i32 = arith.constant 0 : i32
    %c0_i32_0 = arith.constant 0 : i32
    %c0_i32_1 = arith.constant 0 : i32
    return %arg0, %c0_i32, %c0_i32_0 : i32, i32, i32
  }
  func.func @transform_4(%arg0: i32, %arg1: i32) -> (i32, i32, i32) {
    %c0_i32 = arith.constant 0 : i32
    %c0_i32_0 = arith.constant 0 : i32
    return %arg0, %arg1, %c0_i32 : i32, i32, i32
  }
  func.func @transform_5(%arg0: i32, %arg1: i32) -> (i32, i32, i32) {
    %c0_i32 = arith.constant 0 : i32
    %c0_i32_0 = arith.constant 0 : i32
    return %arg0, %arg1, %c0_i32 : i32, i32, i32
  }
}

</mosaic_0001>

<bundles_post_ra>
// kernel: tpu_custom_call.1
= control target key start
LH: loop header
LB: loop body
LE: loop exit
PB: predicated region body
PF: predicated region fallthrough
CT: control target
= control target key end

     0   :  { %s2354_s0 = inlined_call_operand.hbm [shape: f32[2,128,128], index: 0, kind: input, shape index: {}]   ;;  %s2355_s1 = inlined_call_operand.hbm [shape: f32[2,256,128], index: 1, kind: input, shape index: {}]   ;;  %s2356_s2 = inlined_call_operand.hbm [shape: f32[2,256,128], index: 2, kind: input, shape index: {}]   ;;  %s2357_s3 = inlined_call_operand.vmem [shape: f32[2,1,256], index: 3, kind: input, shape index: {}]   ;;  %s2358_s4 = inlined_call_operand.hbm [shape: f32[2,128,128], index: 4, kind: output, shape index: {0}]   ;;  %s2359_s5 = inlined_call_operand.hbm [shape: f32[2,128,256], index: 5, kind: output, shape index: {1}]  }
   0x1   :  { %2385 = sst [smem:[#allocation24_spill]] %s2355_s1 }
   0x2   :  { %2386 = sst [smem:[#allocation25_spill]] %s2357_s3 }
   0x3   :  { %2387 = sst [smem:[#allocation26_spill]] %s2358_s4 }
   0x4   :  { %2388 = sst [smem:[#allocation27_spill]] %s2359_s5 }
   0x5   :  { %11 = vsyncpa [#allocation3], 0 }
   0x6   :  { %13 = vsyncpa [#allocation3 + $0x1], 0 }
   0x7   :  { %14 = vsyncpa [#allocation6], 0 }
   0x8   :  { %16 = vsyncpa [#allocation6 + $0x1], 0 }
   0x9   :  { %17 = vsyncpa [#allocation4], 0 }
   0xa   :  { %19 = vsyncpa [#allocation4 + $0x1], 0 }
   0xb   :  { %20 = vsyncpa [#allocation10], 0 }
   0xc   :  { %22 = vsyncpa [#allocation10 + $0x1], 0  ;;  %s1718_s18 = smov 0   ;;  %s1720_s19 = smov 0  }
   0xd   :  { %s1722_s20 = smov 0   ;;  %s1724_s21 = smov 0  }
   0xe   :  { %s1726_s22 = smov 0   ;;  %s1728_s23 = smov 0  }
   0xf   :  { %s1730_s24 = smov 0   ;;  %s1732_s25 = smov 0  }
  0x10   :  { %s1734_s26 = smov 0   ;;  %s1736_s27 = smov 0  }
  0x11   :  { %s1738_s28 = smov 0  }
  0x12 LB: > { %2389 = sst [smem:[#allocation15_spill]] %s1639_s19  ;;  %s1772_s29 = sadd.s32 4294967295, %s1675_s28   ;;  %s1675_s28 = sphi %s1738_s28, %s28_s28   ;;  %s1671_s27 = sphi %s1736_s27, %s2443_s27   ;;  %s1667_s26 = sphi %s1734_s26, %s2442_s26   ;;  %s1663_s25 = sphi %s1732_s25, %s2441_s25   ;;  %s1659_s24 = sphi %s1730_s24, %s2440_s24   ;;  %s1655_s23 = sphi %s1728_s23, %s2439_s23   ;;  %s1651_s22 = sphi %s1726_s22, %s2438_s22   ;;  %s1647_s21 = sphi %s1724_s21, %s2437_s21   ;;  %s1643_s20 = sphi %s1722_s20, %s2436_s20   ;;  %s1639_s19 = sphi %s1720_s19, %s2435_s19   ;;  %s1635_s18 = sphi %s1718_s18, %s2433_s18  }
  0x13   : > { %2390 = sst [smem:[#allocation16_spill]] %s1647_s21  ;;  %p2363_p0 = scmp.eq.s32.totalorder %s1675_s28, 0 }
  0x14   : > { %2391 = sst [smem:[#allocation17_spill]] %s1659_s24  ;;  %p2362_p1 = scmp.eq.s32.totalorder %s1772_s29, 0 }
  0x15   : > { %2392 = sst [smem:[#allocation18_spill]] %s1663_s25  ;;  %p82_p2 = scmp.ne.s32.totalorder %s1643_s20, %s1639_s19 }
  0x16   : > { %2393 = sst [smem:[#allocation19_spill]] %s1772_s29  ;;  %p88_p3 = scmp.ne.s32.totalorder %s1639_s19, %s1635_s18 }
  0x17   : > { %p84_p4 = por %p82_p2, %p2363_p0  ;;  %p2361_p5 = scmp.lt.s32.totalorder %s1675_s28, 4 }
  0x18   : > { %p1785_p6 = por %p88_p3, %p2362_p1  ;;  %s243_s7 = sand.u32 1, %s1675_s28  }
  0x19   : > { %s245_s8 = sand.u32 1, %s1643_s20   ;;  %s2360_s10 = sshll.u32 %s1671_s27, 12 }
  0x1a   : > { %s2394_s6 = scalar_select %p1785_p6, 1, 0 }
  0x1b   : > { %s1791_s9 = sshll.u32 %s245_s8, 8  ;;  %s2396_s1 = sld [smem:[#allocation24_spill]] }
  0x1c   : > { %2395 = sst [smem:[#allocation20_spill]] %s2394_s6  ;;  %s247_s14 = scalar_lea.vmem [#allocation5], %s1791_s9 }
  0x1d   : > { %s254_s15 = sshll.u32 %s247_s14, 4  ;;  %p1804_p7 = pnand %p2361_p5, %p84_p4  ;;  %s1809_s15 = int_to_ptr.vmem [resolvable:$true] %s254_s15 }
  0x1e   : > { %s1811_s18 = scalar_lea.sflag [#allocation6], %s243_s7 }
  0x1f   : > { %p2365_p9 = pneg %p1804_p7 }
  0x21   : > { %s1799_s13 = scalar_lea.hbm %s2396_s1, %s2360_s10  ;;  %s1432_s14 = scalar_lea.hbm %s2396_s1, 8192 }
  0x22   : > { %s1427_s8 = scalar_lea.hbm %s1799_s13, 4096  ;;  %p1433_p12 = scmp.lt.u32.totalorder %s1799_s13, %s2396_s1 }
  0x23   : > { %p1428_p8 = scmp.ne.s32.totalorder %s1799_s13, %s1427_s8  ;;  %p1434_p13 = scmp.lt.u32.totalorder %s1432_s14, %s1427_s8 }
  0x24   : > { %p1436_p3 = scmp.lt.u32.totalorder %s1427_s8, %s1799_s13 }
  0x25   : > { %p1430_p10 = pnand %p2365_p9, %p1428_p8  ;;  %p1435_p2 = por %p1434_p13, %p1433_p12 }
  0x27   : > { %p1431_p11 = pneg %p1430_p10  ;;  %p1437_p4 = por %p1436_p3, %p1435_p2 }
  0x29   : > { %p1438_p5 = pnand %p1437_p4, %p1431_p11 }
  0x2b   : > { %1441 = shalt.err (!%p1438_p5)
}
  0x2c   : > { %s1442_s7 = scalar_lea.vmem %s1809_s15, 4096  ;;  %s1677_s11 = smov [#allocation5]  }
  0x2d   : > { %p1443_p8 = scmp.ne.s32.totalorder %s1809_s15, %s1442_s7  ;;  %s1447_s12 = sshll.u32 %s1677_s11, 4  ;;  %s1448_s12 = int_to_ptr.vmem [resolvable:$false] %s1447_s12 }
  0x2e   : > { %s1449_s30 = scalar_lea.vmem %s1448_s12, 8192  ;;  %p1450_p0 = scmp.lt.s32.totalorder %s1809_s15, %s1448_s12 }
  0x2f   : > { %p1445_p10 = pnand %p1443_p8, %p2365_p9  ;;  %p1451_p12 = scmp.lt.s32.totalorder %s1449_s30, %s1442_s7 }
  0x31   : > { %p1446_p1 = pneg %p1445_p10  ;;  %p1452_p13 = por %p1451_p12, %p1450_p0 }
  0x33   : > { %p1453_p2 = pnand %p1452_p13, %p1446_p1 }
  0x35   : > { %1456 = shalt.err (!%p1453_p2)
}
  0x36   : > { %s2366_s10 = smov 128   ;;  %s2368_s8 = smov 8  }
  0x37   : > { %1272 = dma.hbm_to_vmem [thread:$0]  (!%p1804_p7), %s1799_s13, 4096, %s1809_s15, %s1811_s18, %s2366_s10, %s2366_s10, %s2368_s8  }
  0x38   : > { %s2398_s14 = sshll.u32 %s1671_s27, 12  ;;  %p1067_p0 = scmp.ge.s32.totalorder %s1675_s28, 1 }
  0x39   : > { %s1847_s12 = scalar_lea.hbm %s2356_s2, %s2398_s14  ;;  %s268_s30 = scalar_lea.vmem [#allocation7], %s1791_s9 }
  0x3a   : > { %s1851_s17 = sshll.u32 %s268_s30, 4  ;;  %p290_p1 = scmp.lt.s32.totalorder %s1675_s28, 5  ;;  %s1919_s17 = int_to_ptr.vmem [resolvable:$true] %s1851_s17 }
  0x3b   : > { %s1054_s4 = sadd.s32 4294967294, %s1675_s28   ;;  %s37_s13 = sadd.s32 1, %s1667_s26 }
  0x3c   : > { %p1854_p5 = pnand %p1067_p0, %p290_p1  ;;  %s49_s15 = sadd.s32 1, %s1655_s23 }
  0x3d   : > { %p38_p11 = scmp.ge.s32.totalorder %s37_s13, 2  ;;  %p56_p3 = scmp.ne.s32.totalorder %s1655_s23, %s1651_s22 }
  0x3e   : > { %s2399_s1 = scalar_select %p1854_p5, 1, 0 }
  0x3f   : > { %p62_p4 = scmp.ne.s32.totalorder %s1651_s22, %s1647_s21  ;;  %p166_p8 = scmp.eq.s32.totalorder %s1772_s29, 3 }
  0x40   : > { %s2445_s13 = smov (%p38_p11, %s37_s13), 0  ;;  %s2401_s9 = sadd.s32 1, %s1671_s27 }
  0x41   : > { %2400 = sst [smem:[#allocation21_spill]] %s2445_s13  ;;  %s2447_s9 = smov (!%p38_p11, %s2401_s9), %s1671_s27 }
  0x42   : > { %s45_s14 = ssub.s32 %s1667_s26, %s2445_s13  ;;  %p2402_p10 = scmp.eq.s32.totalorder %s1675_s28, 0 }
  0x43   : > { %p42_p13 = scmp.ge.s32.totalorder %s2447_s9, 2  ;;  %p2404_p2 = scmp.eq.s32.totalorder %s1772_s29, 0 }
  0x44   : > { %p1875_p12 = por %p2402_p10, %p56_p3  ;;  %p1885_p1 = por %p166_p8, %p56_p3 }
  0x45   : > { %p1881_p0 = por %p2404_p2, %p62_p4  ;;  %p172_p11 = scmp.eq.s32.totalorder %s1054_s4, 3 }
  0x46   : > { %s2406_s30 = scalar_select %p1885_p1, 1, 0 }
  0x47   : > { %s2405_s11 = scalar_select %p1881_p0, 1, 0 }
  0x48   : > { %2407 = sst [smem:[#allocation22_spill]] %s2406_s30  ;;  %s2449_s9 = smov (%p42_p13, %s2447_s9), 0 }
  0x49   : > { %p1891_p9 = por %p172_p11, %p62_p4  ;;  %s220_s8 = sand.u32 1, %s1655_s23  }
  0x4a   : > { %s44_s13 = ssub.s32 %s1671_s27, %s2449_s9  ;;  %s1057_s5 = sshll.u32 %s220_s8, 6 }
  0x4b   : > { %s2408_s10 = scalar_select %p1891_p9, 1, 0 }
  0x4c   : > { %s46_s21 = sor.u32 %s45_s14, %s44_s13  ;;  %p73_p10 = scmp.eq.s32.totalorder %s44_s13, 0 }
  0x4d   : > { %2409 = sst [smem:[#allocation23_spill]] %s2408_s10  ;;  %p47_p2 = scmp.eq.s32.totalorder %s46_s21, 0 }
  0x4e   : > { %s2410_s24 = sadd.s32 1, %s1643_s20  ;;  %s1058_s30 = sshll.u32 %s1667_s26, 3 }
  0x4f   : > { %s1901_s3 = scalar_select %p73_p10, %s1643_s20, %s2410_s24  }
  0x50   : > { %s1904_s4 = scalar_select %p47_p2, %s1655_s23, %s49_s15  }
  0x51   : > { %s1059_s25 = sshll.u32 %s1671_s27, 4  ;;  %s224_s6 = scalar_lea.vmem [#allocation2], %s1057_s5 }
  0x52   : > { %s233_s19 = sshll.u32 %s224_s6, 4  ;;  %s230_s29 = sadd.s32 %s1059_s25, %s1058_s30  ;;  %s1908_s19 = int_to_ptr.vmem [resolvable:$true] %s233_s19 }
  0x53   : > { %s1060_s10 = sshll.u32 %s230_s29, 7  ;;  %p2411_p3 = scmp.lt.s32.totalorder %s1675_s28, 4 }
  0x54   : > { %s1924_s13 = scalar_lea.hbm %s2354_s0, %s1060_s10  ;;  %s1926_s5 = scalar_lea.sflag [#allocation3], %s220_s8 }
  0x55   : > { %p1914_p4 = pnand %p2411_p3, %p1875_p12  ;;  %s1457_s25 = scalar_lea.hbm %s1924_s13, 1024 }
  0x56   : > { %p1458_p8 = scmp.ne.s32.totalorder %s1924_s13, %s1457_s25  ;;  %s1462_s15 = scalar_lea.hbm %s2354_s0, 4096 }
  0x57   : > { %p1459_p12 = pneg %p1914_p4  ;;  %p1463_p10 = scmp.lt.u32.totalorder %s1924_s13, %s2354_s0 }
  0x58   : > { %p1464_p2 = scmp.lt.u32.totalorder %s1462_s15, %s1457_s25  ;;  %p1466_p9 = scmp.lt.u32.totalorder %s1457_s25, %s1924_s13 }
  0x59   : > { %p1460_p13 = pnand %p1459_p12, %p1458_p8 }
  0x5a   : > { %p1465_p3 = por %p1464_p2, %p1463_p10 }
  0x5b   : > { %p1461_p11 = pneg %p1460_p13 }
  0x5c   : > { %p1467_p1 = por %p1466_p9, %p1465_p3 }
  0x5e   : > { %p1468_p6 = pnand %p1467_p1, %p1461_p11 }
  0x60   : > { %1471 = shalt.err (!%p1468_p6)
}
  0x61   : > { %s1472_s8 = scalar_lea.vmem %s1908_s19, 1024  ;;  %s1680_s30 = smov [#allocation2]  }
  0x62   : > { %p1473_p8 = scmp.ne.s32.totalorder %s1908_s19, %s1472_s8  ;;  %s1477_s21 = sshll.u32 %s1680_s30, 4  ;;  %s1478_s21 = int_to_ptr.vmem [resolvable:$false] %s1477_s21 }
  0x63   : > { %s1479_s24 = scalar_lea.vmem %s1478_s21, 2048  ;;  %p1480_p5 = scmp.lt.s32.totalorder %s1908_s19, %s1478_s21 }
  0x64   : > { %p1475_p13 = pnand %p1473_p8, %p1459_p12  ;;  %p1481_p10 = scmp.lt.s32.totalorder %s1479_s24, %s1472_s8 }
  0x66   : > { %p1476_p0 = pneg %p1475_p13  ;;  %p1482_p2 = por %p1481_p10, %p1480_p5 }
  0x68   : > { %p1483_p9 = pnand %p1482_p2, %p1476_p0 }
  0x6a   : > { %1486 = shalt.err (!%p1483_p9)
}
  0x6b   : > { %s2413_s25 = smov 8   ;;  %s2414_s29 = smov 128  }
  0x6c   : > { %1269 = dma.hbm_to_vmem [thread:$0]  (!%p1914_p4), %s1924_s13, 1024, %s1908_s19, %s1926_s5, %s2414_s29, %s2414_s29, %s2413_s25  }
  0x6d   : > { %s1487_s6 = scalar_lea.hbm %s1847_s12, 4096  ;;  %p2415_p5 = pneg %p1804_p7 }
  0x6e   : > { %p1488_p6 = scmp.ne.s32.totalorder %s1847_s12, %s1487_s6  ;;  %s1492_s10 = scalar_lea.hbm %s2356_s2, 8192 }
  0x6f   : > { %p1493_p12 = scmp.lt.u32.totalorder %s1847_s12, %s2356_s2  ;;  %p1494_p11 = scmp.lt.u32.totalorder %s1492_s10, %s1487_s6 }
  0x70   : > { %p1490_p0 = pnand %p1488_p6, %p2415_p5  ;;  %p1496_p8 = scmp.lt.u32.totalorder %s1487_s6, %s1847_s12 }
  0x71   : > { %p1495_p3 = por %p1494_p11, %p1493_p12 }
  0x72   : > { %p1491_p1 = pneg %p1490_p0 }
  0x73   : > { %p1497_p13 = por %p1496_p8, %p1495_p3 }
  0x75   : > { %p1498_p10 = pnand %p1497_p13, %p1491_p1 }
  0x77   : > { %1501 = shalt.err (!%p1498_p10)
}
  0x78   : > { %s1502_s19 = scalar_lea.vmem %s1919_s17, 4096  ;;  %p2416_p2 = pmov %p2415_p5 }
  0x79   : > { %p1503_p4 = scmp.ne.s32.totalorder %s1919_s17, %s1502_s19  ;;  %s1681_s13 = smov [#allocation7]  }
  0x7a   : > { %s1507_s5 = sshll.u32 %s1681_s13, 4  ;;  %s1508_s5 = int_to_ptr.vmem [resolvable:$false] %s1507_s5 }
  0x7b   : > { %p1505_p9 = pnand %p1503_p4, %p2416_p2  ;;  %s1509_s30 = scalar_lea.vmem %s1508_s5, 8192 }
  0x7c   : > { %p1510_p5 = scmp.lt.s32.totalorder %s1919_s17, %s1508_s5  ;;  %p1511_p0 = scmp.lt.s32.totalorder %s1509_s30, %s1502_s19 }
  0x7d   : > { %p1506_p6 = pneg %p1505_p9 }
  0x7e   : > { %p1512_p12 = por %p1511_p0, %p1510_p5 }
  0x80   : > { %p1513_p11 = pnand %p1512_p12, %p1506_p6 }
  0x82   : > { %1516 = shalt.err (!%p1513_p11)
}
  0x83   : > { %1275 = dma.hbm_to_vmem [thread:$0]  (!%p1804_p7), %s1847_s12, 4096, %s1919_s17, %s1811_s18, %s2414_s29, %s2414_s29, %s2413_s25  }
  0x84   : > { %p2417_p1 = scmp.ne.s32.totalorder %s2399_s1, 0 }
  0x85   : > { %s1987_s21 = sand.u32 (!%p2417_p1), 1, %s1651_s22   ;;  %p2418_p3 = scmp.ne.s32.totalorder (!%p2417_p1), %s2405_s11, 0 }
  0x86   : > { %294 = sbr.rel (%p2417_p1) target bundleno = 1011 (0x3f3), region = 36  ;;  %s1068_s24 = sshll.u32 (!%p2417_p1), %s1987_s21, 6 }
  0x87   : > { %s297_s6 = scalar_lea.sflag (!%p2417_p1), [#allocation3], %s1987_s21  ;;  %s1993_s16 = scalar_lea.vmem (!%p2417_p1), [#allocation2], %s1068_s24 }
  0x8d   : > { %1618 = dma.done.wait (%p2418_p3), %s297_s6, 1024  }
  0x8e   : > { %1620 = vsyncadd (%p2418_p3), %s297_s6, 4294966272  ;;  %s2419_s17 = sld [smem:[#allocation19_spill]]  ;;  %s2420_s1 = sld [smem:[#allocation15_spill]] }
  0x8f   : > { %s2421_s18 = sld [smem:[#allocation20_spill]] }
  0x94   : > { %s305_s12 = sand.u32 1, %s2419_s17   ;;  %s307_s25 = sand.u32 1, %s2420_s1  }
  0x95   : > { %s2001_s29 = sshll.u32 %s307_s25, 8  ;;  %s306_s15 = scalar_lea.sflag [#allocation6], %s305_s12 }
  0x96   : > { %s2004_s14 = scalar_lea.vmem [#allocation5], %s2001_s29  ;;  %p2422_p7 = scmp.ne.s32.totalorder %s2421_s18, 0 }
  0x98   : > { %1622 = dma.done.wait (%p2422_p7), %s306_s15, 8192  }
  0x99   : > { %1624 = vsyncadd (%p2422_p7), %s306_s15, 4294959104  ;;  %v395_v0 = vld [vmem:[%s2004_s14 + $0x80] sm:$0xff]  ;;  %v396_v1 = vld [vmem:[%s2004_s14 + $0x88] sm:$0xff]  ;;  %s2423_s11 = sld [smem:[#allocation18_spill]]  ;;  %s2424_s13 = sld [smem:[#allocation25_spill]] }
  0x9a   : > { %v379_v2 = vld [vmem:[%s2004_s14] sm:$0xff]  ;;  %v1192_v3 = vpack.c.bf16 %v396_v1, %v395_v0  ;;  %v380_v4 = vld [vmem:[%s2004_s14 + $0x8] sm:$0xff]  ;;  %v397_v5 = vld [vmem:[%s2004_s14 + $0x90] sm:$0xff]  ;;  %v453_v0 = vlaneseq  ;;  %s2104_s30 = scalar_lea.vmem [#allocation7], %s2001_s29  ;;  %s1072_s6 = sshll.u32 %s1987_s21, 7 }
  0x9b   : > { %v398_v6 = vld [vmem:[%s2004_s14 + $0x98] sm:$0xff]  ;;  %v1194_v7 = vpack.c.bf16 %v380_v4, %v379_v2  ;;  %v381_v9 = vld [vmem:[%s2004_s14 + $0x10] sm:$0xff]  ;;  %v399_v11 = vld [vmem:[%s2004_s14 + $0xa0] sm:$0xff]  ;;  %s2425_s17 = sld [smem:[#allocation17_spill]]  ;;  %s2426_s1 = sld [smem:[#allocation22_spill]] }
  0x9c   : > { %v1196_v8 = vpack.c.bf16 %v398_v6, %v397_v5  ;;  %1193 = vmatprep.subr.bf16.mxu0 %v1192_v3  ;;  %v382_v10 = vld [vmem:[%s2004_s14 + $0x18] sm:$0xff]  ;;  %v400_v12 = vld [vmem:[%s2004_s14 + $0xa8] sm:$0xff]  ;;  %v371_v15 = vld [vmem:[%s1993_s16] sm:$0xff]  ;;  %v454_v1 = vshrl.u32 %v453_v0, 7  ;;  %s839_s19 = scalar_lea.sflag [#allocation10], %s1987_s21 }
  0x9d   : > { %1195 = vmatpush3.bf16.xpose.msra.mxu0 %v1194_v7  ;;  %v1198_v13 = vpack.c.bf16 %v382_v10, %v381_v9  ;;  %v1200_v14 = vpack.c.bf16 %v400_v12, %v399_v11  ;;  %v443_v16 = vmul.f32 0.088388346, %v371_v15  ;;  %v383_v17 = vld [vmem:[%s2004_s14 + $0x20] sm:$0xff]  ;;  %v384_v18 = vld [vmem:[%s2004_s14 + $0x28] sm:$0xff]  ;;  %v401_v19 = vld [vmem:[%s2004_s14 + $0xb0] sm:$0xff] }
  0x9e   : > { %1197 = vmatprep.subr.bf16.mxu0 %v1196_v8  ;;  %v402_v20 = vld [vmem:[%s2004_s14 + $0xb8] sm:$0xff]  ;;  %v1202_v21 = vpack.c.bf16 %v384_v18, %v383_v17  ;;  %v385_v23 = vld [vmem:[%s2004_s14 + $0x30] sm:$0xff]  ;;  %v403_v25 = vld [vmem:[%s2004_s14 + $0xc0] sm:$0xff]  ;;  %v455_v2 = vsub.s32 0, %v454_v1  ;;  %v459_v4 = vsub.s32 1, %v454_v1 }
  0x9f   : > { %1120 = vmatprep.mubr.f32.mxu0 %v443_v16  ;;  %v1204_v22 = vpack.c.bf16 %v402_v20, %v401_v19  ;;  %v386_v24 = vld [vmem:[%s2004_s14 + $0x38] sm:$0xff]  ;;  %v404_v26 = vld [vmem:[%s2004_s14 + $0xc8] sm:$0xff]  ;;  %v387_v29 = vld [vmem:[%s2004_s14 + $0x40] sm:$0xff]  ;;  %p365_p8 = scmp.lt.s32.totalorder %s2423_s11, 1  ;;  %s1081_s12 = sshll.u32 %s2423_s11, 5 }
  0xa0   : > { %v1206_v27 = vpack.c.bf16 %v386_v24, %v385_v23  ;;  %v1208_v28 = vpack.c.bf16 %v404_v26, %v403_v25  ;;  %v388_v30 = vld [vmem:[%s2004_s14 + $0x48] sm:$0xff]  ;;  %v405_v31 = vld [vmem:[%s2004_s14 + $0xd0] sm:$0xff]  ;;  %v406_v32 = vld [vmem:[%s2004_s14 + $0xd8] sm:$0xff] }
  0xa1   : > { %v1210_v33 = vpack.c.bf16 %v388_v30, %v387_v29  ;;  %v1212_v34 = vpack.c.bf16 %v406_v32, %v405_v31  ;;  %v389_v35 = vld [vmem:[%s2004_s14 + $0x50] sm:$0xff]  ;;  %v390_v36 = vld [vmem:[%s2004_s14 + $0x58] sm:$0xff]  ;;  %v407_v37 = vld [vmem:[%s2004_s14 + $0xe0] sm:$0xff]  ;;  %s366_s10 = scalar_select %p365_p8, %s2423_s11, 1 }
  0xa2   : > { %v408_v38 = vld [vmem:[%s2004_s14 + $0xe8] sm:$0xff]  ;;  %v1214_v39 = vpack.c.bf16 %v390_v36, %v389_v35  ;;  %v391_v41 = vld [vmem:[%s2004_s14 + $0x60] sm:$0xff]  ;;  %v409_v43 = vld [vmem:[%s2004_s14 + $0xf0] sm:$0xff]  ;;  %s1087_s18 = sshll.u32 %s2425_s17, 4  ;;  %p2428_p10 = scmp.ne.s32.totalorder %s2426_s1, 0 }
  0xa3   : > { %v1216_v40 = vpack.c.bf16 %v408_v38, %v407_v37  ;;  %v392_v42 = vld [vmem:[%s2004_s14 + $0x68] sm:$0xff]  ;;  %v410_v44 = vld [vmem:[%s2004_s14 + $0xf8] sm:$0xff]  ;;  %v393_v47 = vld [vmem:[%s2004_s14 + $0x70] sm:$0xff]  ;;  %s1073_s7 = sshll.u32 %s366_s10, 1  ;;  %s870_s25 = sadd.s32 %s1087_s18, %s1081_s12 }
  0xa4   : > { %v1218_v45 = vpack.c.bf16 %v392_v42, %v391_v41  ;;  %v1220_v46 = vpack.c.bf16 %v410_v44, %v409_v43  ;;  %v394_v48 = vld [vmem:[%s2004_s14 + $0x78] sm:$0xff]  ;;  %v372_v50 = vld [vmem:[%s1993_s16 + $0x8] sm:$0xff]  ;;  %v373_v52 = vld [vmem:[%s1993_s16 + $0x10] sm:$0xff]  ;;  %s368_s5 = scalar_lea.vmem %s2424_s13, %s1073_s7  ;;  %s1082_s29 = sshll.u32 %s870_s25, 7 }
  0xa5   : > { %1199 = vmatpush3.bf16.xpose.msra.mxu0 %v1198_v13  ;;  %v1222_v49 = vpack.c.bf16 %v394_v48, %v393_v47  ;;  %v444_v51 = vmul.f32 0.088388346, %v372_v50  ;;  %v445_v53 = vmul.f32 0.088388346, %v373_v52  ;;  %v374_v54 = vld [vmem:[%s1993_s16 + $0x18] sm:$0xff]  ;;  %v375_v56 = vld [vmem:[%s1993_s16 + $0x20] sm:$0xff] }
  0xa6   : > { %1201 = vmatprep.subr.bf16.mxu0 %v1200_v14  ;;  %v446_v55 = vmul.f32 0.088388346, %v374_v54  ;;  %v447_v57 = vmul.f32 0.088388346, %v375_v56  ;;  %v376_v58 = vld [vmem:[%s1993_s16 + $0x28] sm:$0xff]  ;;  %v377_v60 = vld [vmem:[%s1993_s16 + $0x30] sm:$0xff] }
  0xa7   : > { %v448_v59 = vmul.f32 0.088388346, %v376_v58  ;;  %v449_v61 = vmul.f32 0.088388346, %v377_v60  ;;  %v378_v62 = vld [vmem:[%s1993_s16 + $0x38] sm:$0xff]  ;;  %v427_v47 = vld [vmem:[%s2104_s30 + $0x80] sm:$0xff] }
  0xa8   : > { %v450_v63 = vmul.f32 0.088388346, %v378_v62  ;;  %v451_v3 = vld [vmem:[%s368_s5] sm:$0x3]  ;;  %v428_v48 = vld [vmem:[%s2104_s30 + $0x88] sm:$0xff]  ;;  %v429_v52 = vld [vmem:[%s2104_s30 + $0x90] sm:$0xff] }
  0xa9   : > { %v456_v5 = vrot.slane %v451_v3, %v455_v2  ;;  %v460_v6 = vrot.slane %v451_v3, %v459_v4  ;;  %v1224_v50 = vpack.c.bf16 %v428_v48, %v427_v47  ;;  %v413_v56 = vld [vmem:[%s2104_s30 + $0x10] sm:$0xff]  ;;  %v431_v58 = vld [vmem:[%s2104_s30 + $0xa0] sm:$0xff]  ;;  %v434_v1 = vld [vmem:[%s2104_s30 + $0xb8] sm:$0xff]  ;;  %s2205_s16 = scalar_lea.vmem [#allocation9], %s1072_s6  ;;  %s2427_s7 = sld [smem:[#allocation27_spill]] }
  0xaa   : > { %v415_v62 = vld [vmem:[%s2104_s30 + $0x20] sm:$0xff]  ;;  %v433_v0 = vld [vmem:[%s2104_s30 + $0xb0] sm:$0xff]  ;;  %s873_s15 = sshll.u32 %s2205_s16, 4  ;;  %s1682_s5 = smov [#allocation9]   ;;  %s2245_s15 = int_to_ptr.vmem [resolvable:$true] %s873_s15 }
  0xab   : > { %1225 = vmatprep.subr.bf16.mxu1 %v1224_v50  ;;  %v1236_v3 = vpack.c.bf16 %v434_v1, %v433_v0  ;;  %v417_v4 = vld [vmem:[%s2104_s30 + $0x30] sm:$0xff]  ;;  %s1517_s13 = scalar_lea.vmem %s2245_s15, 2048 }
  0xac   : > { %p1518_p13 = scmp.ne.s32.totalorder %s2245_s15, %s1517_s13 }
  0xad   : > { %1203 = vmatpush3.bf16.xpose.msra.mxu0 %v1202_v21 }
  0xae   : > { %1205 = vmatprep.subr.bf16.mxu0 %v1204_v22  ;;  %p1519_p4 = pnand %p1518_p13, %p2428_p10 }
  0xaf   : > { %s2243_s8 = scalar_lea.hbm %s2427_s7, %s1082_s29 }
  0xb0   : > { %p1520_p2 = pneg %p1519_p4 }
  0xb5   : > { %1207 = vmatpush3.bf16.xpose.msra.mxu0 %v1206_v27 }
  0xb6   : > { %1209 = vmatprep.subr.bf16.mxu0 %v1208_v28 }
  0xbd   : > { %1211 = vmatpush3.bf16.xpose.msra.mxu0 %v1210_v33 }
  0xbe   : > { %1213 = vmatprep.subr.bf16.mxu0 %v1212_v34 }
  0xc5   : > { %1215 = vmatpush3.bf16.xpose.msra.mxu0 %v1214_v39 }
  0xc6   : > { %1217 = vmatprep.subr.bf16.mxu0 %v1216_v40 }
  0xcd   : > { %1219 = vmatpush3.bf16.xpose.msra.mxu0 %v1218_v45 }
  0xce   : > { %1221 = vmatprep.subr.bf16.mxu0 %v1220_v46 }
  0xd5   : > { %1223 = vmatpush3.bf16.xpose.msra.mxu0 %v1222_v49  ;;  %v411_v49 = vld [vmem:[%s2104_s30] sm:$0xff] }
  0xdc   : > { %1121 = vmatmul.mubr.f32.vlgmr.msra.gmra.mrb[0].mxu0 %v443_v16 }
  0xdd   : > { %1122 = vmatprep.mubr.f32.mxu0 %v444_v51 }
  0xe0   : > { %1123 = vmatmul.mubr.f32.gmra.mrb[2].mxu0 %v444_v51  ;;  %v412_v51 = vld [vmem:[%s2104_s30 + $0x8] sm:$0xff] }
  0xe1   : > { %1124 = vmatprep.mubr.f32.mxu0 %v445_v53  ;;  %v1226_v54 = vpack.c.bf16 %v412_v51, %v411_v49 }
  0xe3   : > { %1227 = vmatpush3.bf16.msra.mxu1 %v1226_v54 }
  0xe4   : > { %1125 = vmatmul.mubr.f32.gmra.mrb[4].mxu0 %v445_v53  ;;  %v430_v53 = vld [vmem:[%s2104_s30 + $0x98] sm:$0xff] }
  0xe5   : > { %1126 = vmatprep.mubr.f32.mxu0 %v446_v55 }
  0xe8   : > { %1127 = vmatmul.mubr.f32.gmra.mrb[6].mxu0 %v446_v55  ;;  %v1228_v55 = vpack.c.bf16 %v430_v53, %v429_v52 }
  0xe9   : > { %1128 = vmatprep.mubr.f32.mxu0 %v447_v57 }
  0xea   : > { %1229 = vmatprep.subr.bf16.mxu1 %v1228_v55 }
  0xec   : > { %1129 = vmatmul.mubr.f32.gmra.mrb[8].mxu0 %v447_v57  ;;  %v414_v57 = vld [vmem:[%s2104_s30 + $0x18] sm:$0xff] }
  0xed   : > { %1130 = vmatprep.mubr.f32.mxu0 %v448_v59  ;;  %v1230_v60 = vpack.c.bf16 %v414_v57, %v413_v56 }
  0xef   : > { %1231 = vmatpush3.bf16.msra.mxu1 %v1230_v60 }
  0xf0   : > { %1131 = vmatmul.mubr.f32.gmra.mrb[10].mxu0 %v448_v59  ;;  %v432_v59 = vld [vmem:[%s2104_s30 + $0xa8] sm:$0xff] }
  0xf1   : > { %1132 = vmatprep.mubr.f32.mxu0 %v449_v61 }
  0xf4   : > { %1133 = vmatmul.mubr.f32.gmra.mrb[12].mxu0 %v449_v61  ;;  %v1232_v61 = vpack.c.bf16 %v432_v59, %v431_v58 }
  0xf5   : > { %1134 = vmatprep.mubr.f32.mxu0 %v450_v63 }
  0xf6   : > { %1233 = vmatprep.subr.bf16.mxu1 %v1232_v61 }
  0xf8   : > { %1135 = vmatmul.mubr.f32.gmra.mrb[14].mxu0 %v450_v63  ;;  %v416_v63 = vld [vmem:[%s2104_s30 + $0x28] sm:$0xff] }
  0xf9   : > { %v1234_v2 = vpack.c.bf16 %v416_v63, %v415_v62 }
  0xfb   : > { %1235 = vmatpush3.bf16.msra.mxu1 %v1234_v2 }
  0xfc   : > { %1237 = vmatprep.subr.bf16.mxu1 %v1236_v3 }
 0x1af   : > { %v529_v7 = vpop.f32.mrb[0].mxu0 }
 0x1b0   : > { %v2055_v8 = vadd.f32 %v529_v7, %v456_v5  ;;  %v531_v9 = vpop.f32.mrb[1].mxu0  ;;  %v436_v7 = vld [vmem:[%s2104_s30 + $0xc8] sm:$0xff] }
 0x1b1   : > { %v2057_v10 = vadd.f32 %v531_v9, %v460_v6 }
 0x1b3   : > { %v535_v11 = vpop.f32.mrb[2].mxu0  ;;  %v576_v12 = vmax.f32 %v2055_v8, %v2057_v10 }
 0x1b4   : > { %v2061_v13 = vadd.f32 %v535_v11, %v456_v5  ;;  %v537_v14 = vpop.f32.mrb[3].mxu0 }
 0x1b5   : > { %v2063_v15 = vadd.f32 %v537_v14, %v460_v6  ;;  %577 = vmax.xlane.f32.xlu0 %v576_v12  ;;  %v419_v12 = vld [vmem:[%s2104_s30 + $0x40] sm:$0xff]  ;;  %v420_v14 = vld [vmem:[%s2104_s30 + $0x48] sm:$0xff] }
 0x1b7   : > { %v541_v16 = vpop.f32.mrb[4].mxu0  ;;  %v579_v17 = vmax.f32 %v2061_v13, %v2063_v15 }
 0x1b8   : > { %v2067_v18 = vadd.f32 %v541_v16, %v456_v5  ;;  %v543_v19 = vpop.f32.mrb[5].mxu0  ;;  %v1242_v16 = vpack.c.bf16 %v420_v14, %v419_v12 }
 0x1b9   : > { %v2069_v20 = vadd.f32 %v543_v19, %v460_v6  ;;  %580 = vmax.xlane.f32.xlu0 %v579_v17 }
 0x1bb   : > { %v547_v21 = vpop.f32.mrb[6].mxu0  ;;  %v582_v22 = vmax.f32 %v2067_v18, %v2069_v20 }
 0x1bc   : > { %v2073_v23 = vadd.f32 %v547_v21, %v456_v5  ;;  %v549_v24 = vpop.f32.mrb[7].mxu0 }
 0x1bd   : > { %v2075_v25 = vadd.f32 %v549_v24, %v460_v6  ;;  %583 = vmax.xlane.f32.xlu1 %v582_v22 }
 0x1bf   : > { %v553_v26 = vpop.f32.mrb[8].mxu0  ;;  %v585_v27 = vmax.f32 %v2073_v23, %v2075_v25 }
 0x1c0   : > { %v2079_v28 = vadd.f32 %v553_v26, %v456_v5  ;;  %v555_v29 = vpop.f32.mrb[9].mxu0 }
 0x1c1   : > { %v2081_v30 = vadd.f32 %v555_v29, %v460_v6  ;;  %586 = vmax.xlane.f32.xlu1 %v585_v27 }
 0x1c3   : > { %v559_v31 = vpop.f32.mrb[10].mxu0  ;;  %v588_v32 = vmax.f32 %v2079_v28, %v2081_v30 }
 0x1c4   : > { %v2085_v33 = vadd.f32 %v559_v31, %v456_v5  ;;  %v561_v34 = vpop.f32.mrb[11].mxu0 }
 0x1c5   : > { %v2087_v35 = vadd.f32 %v561_v34, %v460_v6  ;;  %589 = vmax.xlane.f32.xlu0 %v588_v32 }
 0x1c7   : > { %v565_v36 = vpop.f32.mrb[12].mxu0  ;;  %v591_v37 = vmax.f32 %v2085_v33, %v2087_v35 }
 0x1c8   : > { %v2091_v38 = vadd.f32 %v565_v36, %v456_v5  ;;  %v567_v39 = vpop.f32.mrb[13].mxu0 }
 0x1c9   : > { %v2093_v40 = vadd.f32 %v567_v39, %v460_v6  ;;  %592 = vmax.xlane.f32.xlu1 %v591_v37 }
 0x1cb   : > { %v571_v41 = vpop.f32.mrb[14].mxu0  ;;  %v594_v42 = vmax.f32 %v2091_v38, %v2093_v40 }
 0x1cc   : > { %v2097_v43 = vadd.f32 %v571_v41, %v456_v5  ;;  %v573_v44 = vpop.f32.mrb[15].mxu0  ;;  %v418_v5 = vld [vmem:[%s2104_s30 + $0x38] sm:$0xff] }
 0x1cd   : > { %v2099_v45 = vadd.f32 %v573_v44, %v460_v6  ;;  %595 = vmax.xlane.f32.xlu0 %v594_v42  ;;  %v435_v6 = vld [vmem:[%s2104_s30 + $0xc0] sm:$0xff]  ;;  %v1238_v9 = vpack.c.bf16 %v418_v5, %v417_v4  ;;  %v437_v5 = vld [vmem:[%s2104_s30 + $0xd0] sm:$0xff] }
 0x1ce   : > { %v1240_v11 = vpack.c.bf16 %v436_v7, %v435_v6  ;;  %v438_v6 = vld [vmem:[%s2104_s30 + $0xd8] sm:$0xff]  ;;  %v421_v7 = vld [vmem:[%s2104_s30 + $0x50] sm:$0xff] }
 0x1cf   : > { %v597_v46 = vmax.f32 %v2097_v43, %v2099_v45  ;;  %1239 = vmatpush3.bf16.msra.mxu1 %v1238_v9  ;;  %v422_v9 = vld [vmem:[%s2104_s30 + $0x58] sm:$0xff] }
 0x1d0   : > { %1241 = vmatprep.subr.bf16.mxu1 %v1240_v11  ;;  %v1246_v11 = vpack.c.bf16 %v422_v9, %v421_v7 }
 0x1d1   : > { %598 = vmax.xlane.f32.xlu1 %v597_v46 }
 0x1d3   : > { %1243 = vmatpush3.bf16.msra.mxu1 %v1242_v16  ;;  %v439_v16 = vld [vmem:[%s2104_s30 + $0xe0] sm:$0xff] }
 0x242   : > { %v578_v17 = vpop.xlane.xlu0 %577 }
 0x243   : > { %v600_v19 = vsub.f32 %v2055_v8, %v578_v17  ;;  %v601_v21 = vsub.f32 %v2057_v10, %v578_v17  ;;  %v440_v17 = vld [vmem:[%s2104_s30 + $0xe8] sm:$0xff] }
 0x245   : > { %v616_v22 = vmul.f32 1.442695, %v600_v19  ;;  %v618_v24 = vmul.f32 1.442695, %v601_v21  ;;  %v1248_v21 = vpack.c.bf16 %v440_v17, %v439_v16 }
 0x246   : > { %v581_v26 = vpop.xlane.xlu0 %580 }
 0x247   : > { %1379 = vpow2.f32 %v616_v22  ;;  %v602_v27 = vsub.f32 %v2061_v13, %v581_v26  ;;  %v603_v29 = vsub.f32 %v2063_v15, %v581_v26  ;;  %v423_v22 = vld [vmem:[%s2104_s30 + $0x60] sm:$0xff] }
 0x248   : > { %1381 = vpow2.f32 %v618_v24  ;;  %v424_v24 = vld [vmem:[%s2104_s30 + $0x68] sm:$0xff] }
 0x249   : > { %v620_v31 = vmul.f32 1.442695, %v602_v27  ;;  %v622_v32 = vmul.f32 1.442695, %v603_v29  ;;  %v1250_v26 = vpack.c.bf16 %v424_v24, %v423_v22 }
 0x24a   : > { %v584_v34 = vpop.xlane.xlu1 %583 }
 0x24b   : > { %1383 = vpow2.f32 %v620_v31  ;;  %v604_v36 = vsub.f32 %v2067_v18, %v584_v34  ;;  %v605_v37 = vsub.f32 %v2069_v20, %v584_v34  ;;  %v441_v31 = vld [vmem:[%s2104_s30 + $0xf0] sm:$0xff] }
 0x24c   : > { %1385 = vpow2.f32 %v622_v32  ;;  %v442_v32 = vld [vmem:[%s2104_s30 + $0xf8] sm:$0xff] }
 0x24d   : > { %v624_v8 = vmul.f32 1.442695, %v604_v36  ;;  %v626_v10 = vmul.f32 1.442695, %v605_v37  ;;  %v1252_v36 = vpack.c.bf16 %v442_v32, %v441_v31  ;;  %v425_v37 = vld [vmem:[%s2104_s30 + $0x70] sm:$0xff] }
 0x24e   : > { %v587_v39 = vpop.xlane.xlu1 %586 }
 0x24f   : > { %1387 = vpow2.f32 %v624_v8  ;;  %v606_v41 = vsub.f32 %v2073_v23, %v587_v39  ;;  %v607_v13 = vsub.f32 %v2075_v25, %v587_v39  ;;  %v426_v8 = vld [vmem:[%s2104_s30 + $0x78] sm:$0xff]  ;;  %s1521_s30 = sshll.u32 %s1682_s5, 4  ;;  %s1522_s30 = int_to_ptr.vmem [resolvable:$false] %s1521_s30 }
 0x250   : > { %1389 = vpow2.f32 %v626_v10  ;;  %v1254_v10 = vpack.c.bf16 %v426_v8, %v425_v37  ;;  %s1523_s6 = scalar_lea.vmem %s1522_s30, 4096  ;;  %p1524_p9 = scmp.lt.s32.totalorder %s2245_s15, %s1522_s30 }
 0x251   : > { %v2134_v15 = vpop.eup %1379  ;;  %v628_v42 = vmul.f32 1.442695, %v606_v41  ;;  %v630_v44 = vmul.f32 1.442695, %v607_v13  ;;  %p1525_p6 = scmp.lt.s32.totalorder %s1523_s6, %s1517_s13 }
 0x252   : > { %v2136_v46 = vpop.eup %1381  ;;  %v590_v47 = vpop.xlane.xlu0 %589 }
 0x253   : > { %1391 = vpow2.f32 %v628_v42  ;;  %v608_v18 = vsub.f32 %v2079_v28, %v590_v47  ;;  %v609_v20 = vsub.f32 %v2081_v30, %v590_v47  ;;  %v648_v48 = vadd.f32 %v2136_v46, %v2134_v15  ;;  %p1526_p5 = por %p1525_p6, %p1524_p9 }
 0x254   : > { %1393 = vpow2.f32 %v630_v44 }
 0x255   : > { %v2142_v23 = vpop.eup %1383  ;;  %v632_v25 = vmul.f32 1.442695, %v608_v18  ;;  %v634_v49 = vmul.f32 1.442695, %v609_v20  ;;  %649 = vadd.xlane.f32.xlu0 %v648_v48  ;;  %p1527_p0 = pnand %p1526_p5, %p1520_p2 }
 0x256   : > { %v2144_v50 = vpop.eup %1385  ;;  %v593_v51 = vpop.xlane.xlu1 %592 }
 0x257   : > { %1395 = vpow2.f32 %v632_v25  ;;  %v610_v52 = vsub.f32 %v2085_v33, %v593_v51  ;;  %v611_v53 = vsub.f32 %v2087_v35, %v593_v51  ;;  %v651_v28 = vadd.f32 %v2144_v50, %v2142_v23 }
 0x258   : > { %1397 = vpow2.f32 %v634_v49 }
 0x259   : > { %v2150_v30 = vpop.eup %1387  ;;  %v636_v54 = vmul.f32 1.442695, %v610_v52  ;;  %v638_v55 = vmul.f32 1.442695, %v611_v53  ;;  %652 = vadd.xlane.f32.xlu1 %v651_v28 }
 0x25a   : > { %v2152_v56 = vpop.eup %1389  ;;  %v596_v57 = vpop.xlane.xlu0 %595 }
 0x25b   : > { %1399 = vpow2.f32 %v636_v54  ;;  %v612_v58 = vsub.f32 %v2091_v38, %v596_v57  ;;  %v613_v59 = vsub.f32 %v2093_v40, %v596_v57  ;;  %v654_v33 = vadd.f32 %v2152_v56, %v2150_v30 }
 0x25c   : > { %1401 = vpow2.f32 %v638_v55 }
 0x25d   : > { %v2158_v35 = vpop.eup %1391  ;;  %v640_v60 = vmul.f32 1.442695, %v612_v58  ;;  %v642_v61 = vmul.f32 1.442695, %v613_v59  ;;  %655 = vadd.xlane.f32.xlu0 %v654_v33 }
 0x25e   : > { %v2160_v62 = vpop.eup %1393  ;;  %v599_v63 = vpop.xlane.xlu1 %598 }
 0x25f   : > { %1403 = vpow2.f32 %v640_v60  ;;  %v614_v38 = vsub.f32 %v2097_v43, %v599_v63  ;;  %v615_v40 = vsub.f32 %v2099_v45, %v599_v63  ;;  %v657_v0 = vadd.f32 %v2160_v62, %v2158_v35 }
 0x260   : > { %1405 = vpow2.f32 %v642_v61  ;;  %v1244_v45 = vpack.c.bf16 %v438_v6, %v437_v5 }
 0x261   : > { %v2166_v1 = vpop.eup %1395  ;;  %v644_v2 = vmul.f32 1.442695, %v614_v38  ;;  %v646_v3 = vmul.f32 1.442695, %v615_v40  ;;  %658 = vadd.xlane.f32.xlu1 %v657_v0 }
 0x262   : > { %v2168_v4 = vpop.eup %1397  ;;  %1245 = vmatprep.subr.bf16.mxu1 %v1244_v45 }
 0x263   : > { %1407 = vpow2.f32 %v644_v2  ;;  %v660_v43 = vadd.f32 %v2168_v4, %v2166_v1  ;;  %1247 = vmatpush3.bf16.msra.mxu1 %v1246_v11 }
 0x264   : > { %1409 = vpow2.f32 %v646_v3  ;;  %1249 = vmatprep.subr.bf16.mxu1 %v1248_v21 }
 0x265   : > { %v2176_v12 = vpop.eup %1399  ;;  %661 = vadd.xlane.f32.xlu0 %v660_v43 }
 0x266   : > { %v2178_v14 = vpop.eup %1401 }
 0x267   : > { %v663_v19 = vadd.f32 %v2178_v14, %v2176_v12  ;;  %1251 = vmatpush3.bf16.msra.mxu1 %v1250_v26 }
 0x268   : > { %1253 = vmatprep.subr.bf16.mxu1 %v1252_v36 }
 0x269   : > { %v2186_v27 = vpop.eup %1403  ;;  %664 = vadd.xlane.f32.xlu1 %v663_v19 }
 0x26a   : > { %v2188_v29 = vpop.eup %1405 }
 0x26b   : > { %v666_v34 = vadd.f32 %v2188_v29, %v2186_v27  ;;  %1255 = vmatpush3.bf16.msra.mxu1 %v1254_v10 }
 0x26d   : > { %v2196_v39 = vpop.eup %1407  ;;  %667 = vadd.xlane.f32.xlu0 %v666_v34 }
 0x26e   : > { %v2198_v41 = vpop.eup %1409 }
 0x26f   : > { %v669_v13 = vadd.f32 %v2198_v41, %v2196_v39 }
 0x271   : > { %670 = vadd.xlane.f32.xlu1 %v669_v13 }
 0x2e2   : > { %v650_v42 = vpop.xlane.xlu0 %649 }
 0x2e3   : > { %1411 = vrcp.f32 %v650_v42 }
 0x2e6   : > { %v653_v44 = vpop.xlane.xlu1 %652 }
 0x2e7   : > { %1413 = vrcp.f32 %v653_v44 }
 0x2ea   : > { %v656_v47 = vpop.xlane.xlu0 %655 }
 0x2eb   : > { %1415 = vrcp.f32 %v656_v47 }
 0x2ed   : > { %v1412_v18 = vpop.eup %1411 }
 0x2ee   : > { %v659_v20 = vpop.xlane.xlu1 %658  ;;  %v689_v48 = vmul.f32 %v1412_v18, %v2136_v46  ;;  %v688_v25 = vmul.f32 %v1412_v18, %v2134_v15 }
 0x2ef   : > { %1417 = vrcp.f32 %v659_v20 }
 0x2f0   : > { %705 = vst [vmem:[%s2205_s16 + $0x8] sm:$0xff] %v689_v48  ;;  %784 = vmatprep.mubr.f32.mxu1 %v689_v48  ;;  %704 = vst [vmem:[%s2205_s16] sm:$0xff] %v688_v25 }
 0x2f1   : > { %v1414_v49 = vpop.eup %1413  ;;  %785 = vmatmul.mubr.f32.vlgmr.msra.gmra.mrb[0].mxu1 %v688_v25 }
 0x2f2   : > { %v662_v51 = vpop.xlane.xlu0 %661  ;;  %v691_v52 = vmul.f32 %v1414_v49, %v2144_v50  ;;  %v690_v46 = vmul.f32 %v1414_v49, %v2142_v23 }
 0x2f3   : > { %1419 = vrcp.f32 %v662_v51 }
 0x2f4   : > { %707 = vst [vmem:[%s2205_s16 + $0x18] sm:$0xff] %v691_v52  ;;  %789 = vmatprep.mubr.f32.mxu1 %v691_v52  ;;  %706 = vst [vmem:[%s2205_s16 + $0x10] sm:$0xff] %v690_v46 }
 0x2f5   : > { %v1416_v15 = vpop.eup %1415  ;;  %790 = vmatmul.mubr.f32.gmra.mrb[2].mxu1 %v690_v46 }
 0x2f6   : > { %v665_v53 = vpop.xlane.xlu1 %664  ;;  %v693_v28 = vmul.f32 %v1416_v15, %v2152_v56  ;;  %v692_v54 = vmul.f32 %v1416_v15, %v2150_v30 }
 0x2f7   : > { %1421 = vrcp.f32 %v665_v53 }
 0x2f8   : > { %709 = vst [vmem:[%s2205_s16 + $0x28] sm:$0xff] %v693_v28  ;;  %794 = vmatprep.mubr.f32.mxu1 %v693_v28  ;;  %708 = vst [vmem:[%s2205_s16 + $0x20] sm:$0xff] %v692_v54 }
 0x2f9   : > { %v1418_v50 = vpop.eup %1417  ;;  %795 = vmatmul.mubr.f32.gmra.mrb[4].mxu1 %v692_v54 }
 0x2fa   : > { %v668_v23 = vpop.xlane.xlu0 %667  ;;  %v695_v55 = vmul.f32 %v1418_v50, %v2160_v62  ;;  %v694_v57 = vmul.f32 %v1418_v50, %v2158_v35 }
 0x2fb   : > { %1423 = vrcp.f32 %v668_v23 }
 0x2fc   : > { %711 = vst [vmem:[%s2205_s16 + $0x38] sm:$0xff] %v695_v55  ;;  %799 = vmatprep.mubr.f32.mxu1 %v695_v55  ;;  %710 = vst [vmem:[%s2205_s16 + $0x30] sm:$0xff] %v694_v57 }
 0x2fd   : > { %v1420_v30 = vpop.eup %1419  ;;  %800 = vmatmul.mubr.f32.gmra.mrb[6].mxu1 %v694_v57 }
 0x2fe   : > { %v671_v56 = vpop.xlane.xlu1 %670  ;;  %v697_v58 = vmul.f32 %v1420_v30, %v2168_v4  ;;  %v696_v59 = vmul.f32 %v1420_v30, %v2166_v1 }
 0x2ff   : > { %1425 = vrcp.f32 %v671_v56 }
 0x300   : > { %713 = vst [vmem:[%s2205_s16 + $0x48] sm:$0xff] %v697_v58  ;;  %804 = vmatprep.mubr.f32.mxu1 %v697_v58  ;;  %712 = vst [vmem:[%s2205_s16 + $0x40] sm:$0xff] %v696_v59 }
 0x301   : > { %v1422_v33 = vpop.eup %1421  ;;  %805 = vmatmul.mubr.f32.gmra.mrb[8].mxu1 %v696_v59 }
 0x302   : > { %v699_v35 = vmul.f32 %v1422_v33, %v2178_v14  ;;  %v698_v60 = vmul.f32 %v1422_v33, %v2176_v12 }
 0x304   : > { %715 = vst [vmem:[%s2205_s16 + $0x58] sm:$0xff] %v699_v35  ;;  %809 = vmatprep.mubr.f32.mxu1 %v699_v35  ;;  %714 = vst [vmem:[%s2205_s16 + $0x50] sm:$0xff] %v698_v60 }
 0x305   : > { %v1424_v61 = vpop.eup %1423  ;;  %810 = vmatmul.mubr.f32.gmra.mrb[10].mxu1 %v698_v60 }
 0x306   : > { %v701_v62 = vmul.f32 %v1424_v61, %v2188_v29  ;;  %v700_v63 = vmul.f32 %v1424_v61, %v2186_v27 }
 0x308   : > { %717 = vst [vmem:[%s2205_s16 + $0x68] sm:$0xff] %v701_v62  ;;  %814 = vmatprep.mubr.f32.mxu1 %v701_v62  ;;  %716 = vst [vmem:[%s2205_s16 + $0x60] sm:$0xff] %v700_v63 }
 0x309   : > { %v1426_v38 = vpop.eup %1425  ;;  %815 = vmatmul.mubr.f32.gmra.mrb[12].mxu1 %v700_v63 }
 0x30a   : > { %v703_v40 = vmul.f32 %v1426_v38, %v2198_v41  ;;  %v702_v0 = vmul.f32 %v1426_v38, %v2196_v39 }
 0x30c   : > { %719 = vst [vmem:[%s2205_s16 + $0x78] sm:$0xff] %v703_v40  ;;  %819 = vmatprep.mubr.f32.mxu1 %v703_v40  ;;  %718 = vst [vmem:[%s2205_s16 + $0x70] sm:$0xff] %v702_v0 }
 0x30d   : > { %820 = vmatmul.mubr.f32.gmra.mrb[14].mxu1 %v702_v0 }
 0x30e   : > { %1530 = shalt.err (!%p1527_p0)
}
 0x30f   : > { %s1531_s16 = scalar_lea.hbm %s2243_s8, 2048  ;;  %s1535_s25 = scalar_lea.hbm %s2427_s7, 8192 }
 0x310   : > { %p1532_p12 = scmp.ne.s32.totalorder %s2243_s8, %s1531_s16  ;;  %p1536_p3 = scmp.lt.u32.totalorder %s2243_s8, %s2427_s7 }
 0x311   : > { %p1537_p7 = scmp.lt.u32.totalorder %s1535_s25, %s1531_s16  ;;  %p1539_p13 = scmp.lt.u32.totalorder %s1531_s16, %s2243_s8 }
 0x312   : > { %p1533_p11 = pnand %p1532_p12, %p2428_p10 }
 0x313   : > { %p1538_p8 = por %p1537_p7, %p1536_p3 }
 0x314   : > { %p1534_p1 = pneg %p1533_p11 }
 0x315   : > { %p1540_p4 = por %p1539_p13, %p1538_p8 }
 0x317   : > { %p1541_p2 = pnand %p1540_p4, %p1534_p1 }
 0x319   : > { %1544 = shalt.err (!%p1541_p2)
}
 0x31a   : > { %s1683_s10 = smov 256   ;;  %s1684_s13 = smov 16  }
 0x31b   : > { %1263 = dma.vmem_to_hbm [thread:$0]  (%p2428_p10), %s2245_s15, 2048, %s2243_s8, %s839_s19, %s1683_s10, %s1683_s10, %s1684_s13  }
 0x31c   : > { %s2273_s5 = scalar_lea.vmem [#allocation8], %s1068_s24  ;;  %s1076_s24 = sshll.u32 %s2425_s17, 3 }
 0x31d   : > { %s1077_s15 = sshll.u32 %s2423_s11, 4  ;;  %s854_s19 = sshll.u32 %s2273_s5, 4  ;;  %s2284_s19 = int_to_ptr.vmem [resolvable:$true] %s854_s19 }
 0x31e   : > { %s851_s8 = sadd.s32 %s1077_s15, %s1076_s24  ;;  %s2429_s6 = sld [smem:[#allocation26_spill]] }
 0x31f   : > { %s1078_s30 = sshll.u32 %s851_s8, 7  ;;  %s834_s18 = scalar_lea.sflag [#allocation4], %s1987_s21 }
 0x320   : > { %s1545_s12 = scalar_lea.vmem %s2284_s19, 1024  ;;  %s1685_s25 = smov [#allocation8]  }
 0x321   : > { %p1546_p9 = scmp.ne.s32.totalorder %s2284_s19, %s1545_s12  ;;  %s1549_s29 = sshll.u32 %s1685_s25, 4  ;;  %s1550_s29 = int_to_ptr.vmem [resolvable:$false] %s1549_s29 }
 0x322   : > { %s1551_s14 = scalar_lea.vmem %s1550_s29, 2048  ;;  %p1552_p0 = scmp.lt.s32.totalorder %s2284_s19, %s1550_s29 }
 0x323   : > { %p1547_p6 = pnand %p1546_p9, %p2428_p10  ;;  %p1553_p12 = scmp.lt.s32.totalorder %s1551_s14, %s1545_s12 }
 0x324   : > { %s2290_s16 = scalar_lea.hbm %s2429_s6, %s1078_s30 }
 0x325   : > { %p1548_p5 = pneg %p1547_p6  ;;  %p1554_p11 = por %p1553_p12, %p1552_p0 }
 0x327   : > { %p1555_p1 = pnand %p1554_p11, %p1548_p5 }
 0x3c4   : > { %v1168_v1 = vpop.f32.mrb[0].mxu1 }
 0x3c5   : > { %v1169_v2 = vpop.f32.mrb[1].mxu1 }
 0x3c6   : > { %v1170_v3 = vadd.f32 %v1169_v2, %v1168_v1 }
 0x3c8   : > { %825 = vst [vmem:[%s2273_s5] sm:$0xff] %v1170_v3  ;;  %v1171_v4 = vpop.f32.mrb[2].mxu1 }
 0x3c9   : > { %v1172_v5 = vpop.f32.mrb[3].mxu1 }
 0x3ca   : > { %v1173_v6 = vadd.f32 %v1172_v5, %v1171_v4 }
 0x3cc   : > { %826 = vst [vmem:[%s2273_s5 + $0x8] sm:$0xff] %v1173_v6  ;;  %v1174_v43 = vpop.f32.mrb[4].mxu1 }
 0x3cd   : > { %v1175_v45 = vpop.f32.mrb[5].mxu1 }
 0x3ce   : > { %v1176_v7 = vadd.f32 %v1175_v45, %v1174_v43 }
 0x3d0   : > { %827 = vst [vmem:[%s2273_s5 + $0x10] sm:$0xff] %v1176_v7  ;;  %v1177_v9 = vpop.f32.mrb[6].mxu1 }
 0x3d1   : > { %v1178_v11 = vpop.f32.mrb[7].mxu1 }
 0x3d2   : > { %v1179_v12 = vadd.f32 %v1178_v11, %v1177_v9 }
 0x3d4   : > { %828 = vst [vmem:[%s2273_s5 + $0x18] sm:$0xff] %v1179_v12  ;;  %v1180_v14 = vpop.f32.mrb[8].mxu1 }
 0x3d5   : > { %v1181_v16 = vpop.f32.mrb[9].mxu1 }
 0x3d6   : > { %v1182_v17 = vadd.f32 %v1181_v16, %v1180_v14 }
 0x3d8   : > { %829 = vst [vmem:[%s2273_s5 + $0x20] sm:$0xff] %v1182_v17  ;;  %v1183_v19 = vpop.f32.mrb[10].mxu1 }
 0x3d9   : > { %v1184_v21 = vpop.f32.mrb[11].mxu1 }
 0x3da   : > { %v1185_v22 = vadd.f32 %v1184_v21, %v1183_v19 }
 0x3dc   : > { %830 = vst [vmem:[%s2273_s5 + $0x28] sm:$0xff] %v1185_v22  ;;  %v1186_v24 = vpop.f32.mrb[12].mxu1 }
 0x3dd   : > { %v1187_v26 = vpop.f32.mrb[13].mxu1 }
 0x3de   : > { %v1188_v27 = vadd.f32 %v1187_v26, %v1186_v24 }
 0x3e0   : > { %831 = vst [vmem:[%s2273_s5 + $0x30] sm:$0xff] %v1188_v27  ;;  %v1189_v29 = vpop.f32.mrb[14].mxu1 }
 0x3e1   : > { %v1190_v31 = vpop.f32.mrb[15].mxu1 }
 0x3e2   : > { %v1191_v32 = vadd.f32 %v1190_v31, %v1189_v29 }
 0x3e4   : > { %832 = vst [vmem:[%s2273_s5 + $0x38] sm:$0xff] %v1191_v32 }
 0x3e5   : > { %1558 = shalt.err (!%p1555_p1)
}
 0x3e6   : > { %s1559_s10 = scalar_lea.hbm %s2290_s16, 1024  ;;  %s1563_s24 = scalar_lea.hbm %s2429_s6, 4096 }
 0x3e7   : > { %p1560_p3 = scmp.ne.s32.totalorder %s2290_s16, %s1559_s10  ;;  %p1564_p13 = scmp.lt.u32.totalorder %s2290_s16, %s2429_s6 }
 0x3e8   : > { %p1565_p4 = scmp.lt.u32.totalorder %s1563_s24, %s1559_s10  ;;  %p1567_p9 = scmp.lt.u32.totalorder %s1559_s10, %s2290_s16 }
 0x3e9   : > { %p1561_p7 = pnand %p1560_p3, %p2428_p10 }
 0x3ea   : > { %p1566_p2 = por %p1565_p4, %p1564_p13 }
 0x3eb   : > { %p1562_p8 = pneg %p1561_p7 }
 0x3ec   : > { %p1568_p6 = por %p1567_p9, %p1566_p2 }
 0x3ee   : > { %p1569_p5 = pnand %p1568_p6, %p1562_p8 }
 0x3f0   : > { %1572 = shalt.err (!%p1569_p5)
}
 0x3f1   : > { %s1686_s30 = smov 128   ;;  %s1687_s11 = smov 8  }
 0x3f2   : > { %1262 = dma.vmem_to_hbm [thread:$0]  (%p2428_p10), %s2284_s19, 1024, %s2290_s16, %s834_s18, %s1686_s30, %s1686_s30, %s1687_s11  }
 0x3f3 PF: > { %s2430_s17 = sld [smem:[#allocation16_spill]]  ;;  %s2431_s12 = sld [smem:[#allocation23_spill]] }
 0x3f4   : > { %p1284_p0 = scmp.ge.s32.totalorder %s1675_s28, 2 }
 0x3f9   : > { %s888_s25 = sand.u32 1, %s2430_s17   ;;  %p2432_p12 = scmp.ne.s32.totalorder %s2431_s12, 0 }
 0x3fa   : > { %s889_s29 = scalar_lea.sflag [#allocation4], %s888_s25 }
 0x3fb   : > { %p1277_p11 = pnand %p1284_p0, %p2432_p12 }
 0x3fd   : > { %1626 = dma.done.wait (!%p1277_p11), %s889_s29, 1024  }
 0x3fe   : > { %1628 = vsyncadd (!%p1277_p11), %s889_s29, 4294966272  ;;  %s898_s14 = scalar_lea.sflag [#allocation10], %s888_s25 }
 0x3ff   : > { %1630 = dma.done.wait (!%p1277_p11), %s898_s14, 2048  }
 0x400   : > { %1632 = vsyncadd (!%p1277_p11), %s898_s14, 4294965248  ;;  %s28_s28 = sadd.s32 1, %s1675_s28   ;;  %s2433_s18 = sld [smem:[#allocation15_spill]] }
 0x401   : > { %p25_p1 = scmp.ge.s32.totalorder %s28_s28, 6   ;;  %s2434_s1 = sld [smem:[#allocation21_spill]] }
 0x402   : > { %s2435_s19 = smov %s1643_s20  ;;  %s2436_s20 = smov %s1901_s3 }
 0x403   : > { %s2437_s21 = smov %s1651_s22  ;;  %s2438_s22 = smov %s1655_s23 }
 0x404   : > { %s2439_s23 = smov %s1904_s4  ;;  %s2440_s24 = smov %s1667_s26 }
 0x405   : > { %s2441_s25 = smov %s1671_s27  ;;  %s2443_s27 = smov %s2449_s9 }
 0x406   :  { %27 = sbr.rel (!%p25_p1) target bundleno = 18 (0x12), region = 125 }
 0x407   : > { %s2442_s26 = smov %s2434_s1 }
 0x40d   :  { %903 = vsyncpa [#allocation3], 1 }
 0x40e   :  { %905 = vsyncpa [#allocation3 + $0x1], 1 }
 0x40f   :  { %906 = vsyncpa [#allocation6], 1 }
 0x410   :  { %908 = vsyncpa [#allocation6 + $0x1], 1 }
 0x411   :  { %909 = vsyncpa [#allocation4], 1 }
 0x412   :  { %911 = vsyncpa [#allocation4 + $0x1], 1 }
 0x413   :  { %912 = vsyncpa [#allocation10], 1 }
 0x414   :  { %914 = vsyncpa [#allocation10 + $0x1], 1 }

</bundles_post_ra>
